<compile_context>
chip_gen: v7x
topology: tpu7x:2x2x1
jax: 0.10.0
libtpu: 0.0.40
codegen_flags: <defaults>
</compile_context>

<pallas_src>
import jax
import jax.numpy as jnp
from jax.experimental import pallas as pl
from jax.experimental.pallas import tpu as pltpu


SELU_ALPHA = 1.6732632423543772
SELU_LAMBDA = 1.0507009873554805


# ----------------------------------------------------------------------------
# Kernel
# ----------------------------------------------------------------------------
def _make_critic_kernel(num_layers: int, use_selu: bool):
    """Fused MLP (BN + SELU-lambda folded) + logit-diff log-softmax kernel.

    Ref layout (inputs ... output):
      refs[0]                 : x tile            (tile_b, num_inputs)  native dtype
      per layer l (2 refs)    : W'_l (in_pad, out_pad) mm dtype, b'_l (1, out_pad) f32
      final layer (2 refs)    : w_diff (in_pad, 1) mm dtype, b_diff (1, 1) f32
      refs[-1]                : out tile          (tile_b, 2) f32
    """

    def kernel(*refs):
        x_ref = refs[0]
        out_ref = refs[-1]
        params = refs[1:-1]

        mm_dtype = params[0].dtype          # matmul dtype comes from the weights
        h = x_ref[...].astype(mm_dtype)     # in-VMEM cast; HBM stream stays native

        for l in range(num_layers):
            w = params[2 * l][...]
            b = params[2 * l + 1][...]                      # f32, BN folded in
            z = jnp.dot(h, w, preferred_element_type=jnp.float32) + b
            if use_selu:
                # lambda scale folded into the NEXT layer's weights.
                z = jnp.where(z > 0.0, z, SELU_ALPHA * jnp.expm1(z))
            else:
                z = jnp.maximum(z, 0.0)
            # Dropout: eval mode -> identity.
            # TODO(synk): training-mode dropout (stateful PRNG mask) not emitted.
            h = z.astype(mm_dtype)

        w_diff = params[2 * num_layers][...]                # (in_pad, 1)
        b_diff = params[2 * num_layers + 1][...]            # (1, 1) f32
        d = jnp.dot(h, w_diff, preferred_element_type=jnp.float32) + b_diff  # (tile_b, 1)

        # 2-class log-softmax via logit difference:
        #   out0 = -softplus(d),  out1 = -softplus(-d)
        # stable softplus(x) = max(x, 0) + log1p(exp(-|x|));  softplus(-d) = softplus(d) - d
        sp_pos = jnp.maximum(d, 0.0) + jnp.log1p(jnp.exp(-jnp.abs(d)))
        sp_neg = sp_pos - d
        col = jax.lax.broadcasted_iota(jnp.int32, out_ref.shape, 1)
        out_ref[...] = jnp.where(col == 0, -sp_pos, -sp_neg).astype(out_ref.dtype)

    return kernel


# ----------------------------------------------------------------------------
# Wrapper
# ----------------------------------------------------------------------------
def critic_forward(x, fused_params, *, num_layers: int, use_selu: bool,
                   tile_b: int = 4096, vmem_limit_bytes: int | None = None):
    """Run the fused Critic forward pass as a single gridded Pallas call.

    x:            (B, num_inputs), streamed from HBM in its native dtype.
    fused_params: output of prepare_params (BN/lambda folded, padded, cast
                  once at setup -- no per-call param work here).
    """
    batch, d_in = x.shape

    def round_up(n, m):
        return ((n + m - 1) // m) * m

    max_feat = max([int(p.shape[-1]) for p in fused_params[0::2]] + [d_in, 128])

    # ---- batch-tile selection ------------------------------------------------
    if batch <= tile_b:
        tile_b = batch
    # Guarantee >=2 grid steps so dimension_semantics=("parallel",) can shard
    # the batch axis across v7x's 2 TensorCores (no-op on single-TC v5e/v6e).
    if batch >= 16:
        tile_b = min(tile_b, round_up(pl.cdiv(batch, 2), 8))
    # Cap the per-step working set (x double-buffer + f32 intermediates) so it
    # fits comfortably in v7x's 64 MiB VMEM (32 MiB default scoped).
    per_row_bytes = 2 * d_in * x.dtype.itemsize + 6 * max_feat * 4
    max_rows = max(8, ((24 << 20) // max(per_row_bytes, 1)) // 8 * 8)
    tile_b = min(tile_b, max_rows)
    if tile_b < batch:
        tile_b = round_up(tile_b, 8)
    grid = (pl.cdiv(batch, tile_b),)

    # ---- explicit VMEM budget --------------------------------------------------
    if vmem_limit_bytes is None:
        bytes_x = 2 * tile_b * d_in * x.dtype.itemsize           # double-buffered x
        bytes_act = 4 * tile_b * max_feat * 4                    # f32 intermediates
        bytes_par = sum(int(p.size) * p.dtype.itemsize for p in fused_params)
        bytes_out = 4 * tile_b * 2 * 4
        est = bytes_x + bytes_act + bytes_par + bytes_out
        vmem_limit_bytes = int(min(max(2 * est, 32 << 20), 64 << 20))

    in_specs = [pl.BlockSpec((tile_b, d_in), lambda i: (i, 0))]
    # Params: full-array blocks with a constant index_map -> resident in VMEM
    # across all grid steps (no re-DMA).
    in_specs += [pl.BlockSpec(p.shape, lambda i: (0, 0)) for p in fused_params]
    out_specs = pl.BlockSpec((tile_b, 2), lambda i: (i, 0))

    kernel = _make_critic_kernel(num_layers, use_selu)

    return pl.pallas_call(
        kernel,
        out_shape=jax.ShapeDtypeStruct((batch, 2), jnp.float32),
        grid=grid,
        in_specs=in_specs,
        out_specs=out_specs,
        compiler_params=pltpu.CompilerParams(
            dimension_semantics=("parallel",),
            vmem_limit_bytes=vmem_limit_bytes,
        ),
    )(x, *fused_params)


# ----------------------------------------------------------------------------
# Deterministic parameter construction (synthetic, PyTorch-layout raw params)
# ----------------------------------------------------------------------------
def make_raw_params(key, num_inputs, num_layers, reduction_rate, model_capacity):
    """Raw per-layer params: (W, b, gamma, beta, running_mean, running_var)."""
    sizes = []
    cur = max(2, int(num_inputs * model_capacity))
    for _ in range(num_layers):
        cur = max(2, int(cur * reduction_rate))
        sizes.append(cur)

    hidden_layers = []
    fan_in = num_inputs
    for out_dim in sizes:
        key, kw, kb, kg, kbeta = jax.random.split(key, 5)
        scale = 1.0 / jnp.sqrt(jnp.float32(fan_in))
        w = jax.random.uniform(kw, (fan_in, out_dim), jnp.float32, -scale, scale)
        b = jax.random.uniform(kb, (out_dim,), jnp.float32, -scale, scale)
        gamma = 1.0 + 0.1 * jax.random.normal(kg, (out_dim,), jnp.float32)
        beta = 0.1 * jax.random.normal(kbeta, (out_dim,), jnp.float32)
        rmean = jnp.zeros((out_dim,), jnp.float32)
        rvar = jnp.ones((out_dim,), jnp.float32)
        hidden_layers.append((w, b, gamma, beta, rmean, rvar))
        fan_in = out_dim

    key, kw, kb = jax.random.split(key, 3)
    scale = 1.0 / jnp.sqrt(jnp.float32(fan_in))
    w_out = jax.random.uniform(kw, (fan_in, 2), jnp.float32, -scale, scale)
    b_out = jax.random.uniform(kb, (2,), jnp.float32, -scale, scale)
    return hidden_layers, (w_out, b_out), sizes


def prepare_params(hidden_layers, final_layer, *, use_selu, skip_batch_norm=False,
                   bn_eps=1e-5, pad_to=128, matmul_dtype=jnp.float32):
    """One-time setup: fold eval-mode BatchNorm (and the SELU lambda scale)
    into (W, b), fold the final Linear(h,2) into a logit-difference vector,
    zero-pad hidden dims to `pad_to`, and cast weights to the matmul dtype.
    Biases / b_diff stay f32."""

    def ceil_to(n, m):
        return ((n + m - 1) // m) * m

    fused = []
    if hidden_layers:
        padded_in = hidden_layers[0][0].shape[0]     # input dim: NOT padded
    else:
        padded_in = final_layer[0].shape[0]
    pending_scale = 1.0   # SELU lambda folded into the following layer's weights

    for (w, b, gamma, beta, rmean, rvar) in hidden_layers:
        fan_in, out_dim = w.shape
        if skip_batch_norm:
            scale = jnp.ones((out_dim,), jnp.float32)
            shift = jnp.zeros((out_dim,), jnp.float32)
        else:
            scale = gamma / jnp.sqrt(rvar + bn_eps)
            shift = beta - rmean * scale
        w_f = (w * pending_scale) * scale[None, :]
        b_f = b * scale + shift

        out_pad = ceil_to(out_dim, pad_to)
        w_p = jnp.zeros((padded_in, out_pad), jnp.float32).at[:fan_in, :out_dim].set(w_f)
        b_p = jnp.zeros((1, out_pad), jnp.float32).at[:, :out_dim].set(b_f)
        fused += [w_p.astype(matmul_dtype), b_p]
        padded_in = out_pad
        pending_scale = SELU_LAMBDA if use_selu else 1.0

    w_out, b_out = final_layer
    fan_in, _ = w_out.shape
    w_diff = (w_out[:, 1] - w_out[:, 0]) * pending_scale
    b_diff = (b_out[1] - b_out[0]).reshape(1, 1).astype(jnp.float32)
    w_diff_p = jnp.zeros((padded_in, 1), jnp.float32).at[:fan_in, 0].set(w_diff)
    fused += [w_diff_p.astype(matmul_dtype), b_diff]
    return fused


# ----------------------------------------------------------------------------
# Pure-JAX reference (exact PyTorch op order, eval mode)
# ----------------------------------------------------------------------------
def critic_reference(x, hidden_layers, final_layer, *, use_selu,
                     skip_batch_norm=False, bn_eps=1e-5):
    h = x
    for (w, b, gamma, beta, rmean, rvar) in hidden_layers:
        h = h @ w + b
        if not skip_batch_norm:
            h = (h - rmean) / jnp.sqrt(rvar + bn_eps) * gamma + beta
        if use_selu:
            h = SELU_LAMBDA * jnp.where(h > 0.0, h, SELU_ALPHA * (jnp.exp(h) - 1.0))
        else:
            h = jnp.maximum(h, 0.0)
        # dropout eval -> identity
    w_out, b_out = final_layer
    logits = h @ w_out + b_out
    return jax.nn.log_softmax(logits, axis=1)


if __name__ == "__main__":
    # Small args consistent with the module's constructor.
    num_inputs = 32          # input_size
    num_layers = 3           # args.num_layers
    reduction_rate = 0.8     # args.reduction_rate
    model_capacity = 1.0     # args.model_capacity
    skip_batch_norm = False  # args.skip_batch_norm
    # args.dropout_probability: eval mode -> identity

    key = jax.random.PRNGKey(0)
    key, kparams = jax.random.split(key)
    hidden_layers, final_layer, hidden_sizes = make_raw_params(
        kparams, num_inputs, num_layers, reduction_rate, model_capacity
    )

    # One-time parameter preparation (fold + pad + cast) -- not per call.
    fused_relu = prepare_params(hidden_layers, final_layer, use_selu=False,
                                skip_batch_norm=skip_batch_norm)
    fused_selu = prepare_params(hidden_layers, final_layer, use_selu=True,
                                skip_batch_norm=skip_batch_norm)
    fused_relu_bf16 = prepare_params(hidden_layers, final_layer, use_selu=False,
                                     skip_batch_norm=skip_batch_norm,
                                     matmul_dtype=jnp.bfloat16)

    # --- Small-batch correctness check (ReLU and SELU paths), f32 matmul. ---
    key, kx = jax.random.split(key)
    x_small = jax.random.normal(kx, (8, num_inputs), jnp.float32)
    for use_selu, fused in ((False, fused_relu), (True, fused_selu)):
        out = critic_forward(x_small, fused, num_layers=num_layers, use_selu=use_selu)
        out = jax.block_until_ready(out)
        ref = critic_reference(x_small, hidden_layers, final_layer,
                               use_selu=use_selu, skip_batch_norm=skip_batch_norm)
        assert out.shape == (8, 2)
        assert jnp.allclose(out, ref, atol=1e-3, rtol=1e-3), (use_selu, out, ref)

    # --- Larger batch: >=2 pipelined grid steps (v7x gets both TCs busy). ---
    key, kx = jax.random.split(key)
    x_big = jax.random.normal(kx, (4096, num_inputs), jnp.float32)
    out_big = critic_forward(x_big, fused_relu, num_layers=num_layers, use_selu=False)
    out_big = jax.block_until_ready(out_big)
    ref_big = critic_reference(x_big, hidden_layers, final_layer,
                               use_selu=False, skip_batch_norm=skip_batch_norm)
    assert out_big.shape == (4096, 2)
    assert jnp.allclose(out_big, ref_big, atol=1e-3, rtol=1e-3)

    # --- Ragged batch (tail grid step with padded rows) on the SELU path. ---
    key, kx = jax.random.split(key)
    x_tail = jax.random.normal(kx, (3000, num_inputs), jnp.float32)
    out_tail = critic_forward(x_tail, fused_selu, num_layers=num_layers, use_selu=True)
    out_tail = jax.block_until_ready(out_tail)
    ref_tail = critic_reference(x_tail, hidden_layers, final_layer,
                                use_selu=True, skip_batch_norm=skip_batch_norm)
    assert out_tail.shape == (3000, 2)
    assert bool(jnp.all(jnp.isfinite(out_tail)))
    assert jnp.allclose(out_tail, ref_tail, atol=1e-3, rtol=1e-3)

    # --- bf16 matmul path (x stays f32 in HBM, cast in-VMEM), loose check. ---
    # Per-layer bf16 rounding of activations compounds; ~1e-2 abs error expected.
    out_bf16 = critic_forward(x_small, fused_relu_bf16,
                              num_layers=num_layers, use_selu=False)
    out_bf16 = jax.block_until_ready(out_bf16)
    ref_small = critic_reference(x_small, hidden_layers, final_layer,
                                 use_selu=False, skip_batch_norm=skip_batch_norm)
    assert out_bf16.shape == (8, 2)
    assert bool(jnp.all(jnp.isfinite(out_bf16)))
    assert jnp.allclose(out_bf16, ref_small, atol=2e-1)

    print("KERNEL_OK")
</pallas_src>

<mosaic_0001>
module attributes {stable_mosaic.version = 11 : i64} {
  func.func @kernel(%arg0: i32, %arg1: memref<8x32xf32, #tpu.memory_space<vmem>>, %arg2: memref<32x128xf32, #tpu.memory_space<vmem>>, %arg3: memref<1x128xf32, #tpu.memory_space<vmem>>, %arg4: memref<128x128xf32, #tpu.memory_space<vmem>>, %arg5: memref<1x128xf32, #tpu.memory_space<vmem>>, %arg6: memref<128x128xf32, #tpu.memory_space<vmem>>, %arg7: memref<1x128xf32, #tpu.memory_space<vmem>>, %arg8: memref<128x1xf32, #tpu.memory_space<vmem>>, %arg9: memref<1x1xf32, #tpu.memory_space<vmem>>, %arg10: memref<8x2xf32, #tpu.memory_space<vmem>>) attributes {dimension_semantics = [#tpu.dimension_semantics<parallel>], iteration_bounds = array<i64: 1>, scalar_prefetch = 0 : i64, scratch_operands = 0 : i64, tpu.core_type = #tpu.core_type<tc>, window_params = [{transform_indices = @transform_0, window_bounds = array<i64: 8, 32>}, {pipeline_mode = #tpu.pipeline_mode<synchronous>, transform_indices = @transform_1, window_bounds = array<i64: 32, 128>}, {pipeline_mode = #tpu.pipeline_mode<synchronous>, transform_indices = @transform_2, window_bounds = array<i64: 1, 128>}, {pipeline_mode = #tpu.pipeline_mode<synchronous>, transform_indices = @transform_3, window_bounds = array<i64: 128, 128>}, {pipeline_mode = #tpu.pipeline_mode<synchronous>, transform_indices = @transform_4, window_bounds = array<i64: 1, 128>}, {pipeline_mode = #tpu.pipeline_mode<synchronous>, transform_indices = @transform_5, window_bounds = array<i64: 128, 128>}, {pipeline_mode = #tpu.pipeline_mode<synchronous>, transform_indices = @transform_6, window_bounds = array<i64: 1, 128>}, {pipeline_mode = #tpu.pipeline_mode<synchronous>, transform_indices = @transform_7, window_bounds = array<i64: 128, 1>}, {pipeline_mode = #tpu.pipeline_mode<synchronous>, transform_indices = @transform_8, window_bounds = array<i64: 1, 1>}, {transform_indices = @transform_9, window_bounds = array<i64: 8, 2>}]} {
    %c0 = arith.constant 0 : index
    %c0_0 = arith.constant 0 : index
    %0 = vector.load %arg1[%c0, %c0_0] : memref<8x32xf32, #tpu.memory_space<vmem>>, vector<8x32xf32>
    %c0_1 = arith.constant 0 : index
    %c0_2 = arith.constant 0 : index
    %1 = vector.load %arg2[%c0_1, %c0_2] : memref<32x128xf32, #tpu.memory_space<vmem>>, vector<32x128xf32>
    %c0_3 = arith.constant 0 : index
    %c0_4 = arith.constant 0 : index
    %2 = vector.load %arg3[%c0_3, %c0_4] : memref<1x128xf32, #tpu.memory_space<vmem>>, vector<1x128xf32>
    %cst = arith.constant dense<0.000000e+00> : vector<8x128xf32>
    %3 = tpu.matmul %0, %1, %cst {dimension_numbers = #tpu.dot_dimension_numbers<[1], [0], [0], [1], [0, 0, 1, 1], [], []>} : vector<8x32xf32>, vector<32x128xf32>, vector<8x128xf32> -> vector<8x128xf32>
    %4 = vector.broadcast %2 : vector<1x128xf32> to vector<8x128xf32>
    %5 = arith.addf %3, %4 : vector<8x128xf32>
    %cst_5 = arith.constant 0.000000e+00 : f32
    %6 = vector.broadcast %cst_5 : f32 to vector<8x128xf32>
    %7 = arith.maximumf %5, %6 : vector<8x128xf32>
    %c0_6 = arith.constant 0 : index
    %c0_7 = arith.constant 0 : index
    %8 = vector.load %arg4[%c0_6, %c0_7] : memref<128x128xf32, #tpu.memory_space<vmem>>, vector<128x128xf32>
    %c0_8 = arith.constant 0 : index
    %c0_9 = arith.constant 0 : index
    %9 = vector.load %arg5[%c0_8, %c0_9] : memref<1x128xf32, #tpu.memory_space<vmem>>, vector<1x128xf32>
    %cst_10 = arith.constant dense<0.000000e+00> : vector<8x128xf32>
    %10 = tpu.matmul %7, %8, %cst_10 {dimension_numbers = #tpu.dot_dimension_numbers<[1], [0], [0], [1], [0, 0, 1, 1], [], []>} : vector<8x128xf32>, vector<128x128xf32>, vector<8x128xf32> -> vector<8x128xf32>
    %11 = vector.broadcast %9 : vector<1x128xf32> to vector<8x128xf32>
    %12 = arith.addf %10, %11 : vector<8x128xf32>
    %cst_11 = arith.constant 0.000000e+00 : f32
    %13 = vector.broadcast %cst_11 : f32 to vector<8x128xf32>
    %14 = arith.maximumf %12, %13 : vector<8x128xf32>
    %c0_12 = arith.constant 0 : index
    %c0_13 = arith.constant 0 : index
    %15 = vector.load %arg6[%c0_12, %c0_13] : memref<128x128xf32, #tpu.memory_space<vmem>>, vector<128x128xf32>
    %c0_14 = arith.constant 0 : index
    %c0_15 = arith.constant 0 : index
    %16 = vector.load %arg7[%c0_14, %c0_15] : memref<1x128xf32, #tpu.memory_space<vmem>>, vector<1x128xf32>
    %cst_16 = arith.constant dense<0.000000e+00> : vector<8x128xf32>
    %17 = tpu.matmul %14, %15, %cst_16 {dimension_numbers = #tpu.dot_dimension_numbers<[1], [0], [0], [1], [0, 0, 1, 1], [], []>} : vector<8x128xf32>, vector<128x128xf32>, vector<8x128xf32> -> vector<8x128xf32>
    %18 = vector.broadcast %16 : vector<1x128xf32> to vector<8x128xf32>
    %19 = arith.addf %17, %18 : vector<8x128xf32>
    %cst_17 = arith.constant 0.000000e+00 : f32
    %20 = vector.broadcast %cst_17 : f32 to vector<8x128xf32>
    %21 = arith.maximumf %19, %20 : vector<8x128xf32>
    %c0_18 = arith.constant 0 : index
    %c0_19 = arith.constant 0 : index
    %22 = vector.load %arg8[%c0_18, %c0_19] : memref<128x1xf32, #tpu.memory_space<vmem>>, vector<128x1xf32>
    %c0_20 = arith.constant 0 : index
    %c0_21 = arith.constant 0 : index
    %23 = vector.load %arg9[%c0_20, %c0_21] : memref<1x1xf32, #tpu.memory_space<vmem>>, vector<1x1xf32>
    %cst_22 = arith.constant dense<0.000000e+00> : vector<8x1xf32>
    %24 = tpu.matmul %21, %22, %cst_22 {dimension_numbers = #tpu.dot_dimension_numbers<[1], [0], [0], [1], [0, 0, 1, 1], [], []>} : vector<8x128xf32>, vector<128x1xf32>, vector<8x1xf32> -> vector<8x1xf32>
    %25 = vector.broadcast %23 : vector<1x1xf32> to vector<8x1xf32>
    %26 = arith.addf %24, %25 : vector<8x1xf32>
    %cst_23 = arith.constant 0.000000e+00 : f32
    %27 = vector.broadcast %cst_23 : f32 to vector<8x1xf32>
    %28 = arith.maximumf %26, %27 : vector<8x1xf32>
    %29 = math.absf %26 : vector<8x1xf32>
    %cst_24 = arith.constant 0.000000e+00 : f32
    %30 = vector.broadcast %cst_24 : f32 to vector<8x1xf32>
    %31 = arith.subf %30, %29 : vector<8x1xf32>
    %32 = math.exp %31 : vector<8x1xf32>
    %33 = math.log1p %32 : vector<8x1xf32>
    %34 = arith.addf %28, %33 : vector<8x1xf32>
    %35 = arith.subf %34, %26 : vector<8x1xf32>
    %36 = tpu.iota {dimensions = array<i32: 1>} : vector<8x2xi32>
    %c0_i32 = arith.constant 0 : i32
    %37 = vector.broadcast %c0_i32 : i32 to vector<8x2xi32>
    %38 = arith.cmpi eq, %36, %37 : vector<8x2xi32>
    %cst_25 = arith.constant 0.000000e+00 : f32
    %39 = vector.broadcast %cst_25 : f32 to vector<8x1xf32>
    %40 = arith.subf %39, %34 : vector<8x1xf32>
    %cst_26 = arith.constant 0.000000e+00 : f32
    %41 = vector.broadcast %cst_26 : f32 to vector<8x1xf32>
    %42 = arith.subf %41, %35 : vector<8x1xf32>
    %43 = vector.shape_cast %40 : vector<8x1xf32> to vector<8x1xf32>
    %44 = vector.broadcast %43 : vector<8x1xf32> to vector<8x2xf32>
    %45 = vector.shape_cast %42 : vector<8x1xf32> to vector<8x1xf32>
    %46 = vector.broadcast %45 : vector<8x1xf32> to vector<8x2xf32>
    %47 = arith.select %38, %44, %46 : vector<8x2xi1>, vector<8x2xf32>
    %c0_27 = arith.constant 0 : index
    %c0_28 = arith.constant 0 : index
    %48 = vector.load %arg10[%c0_27, %c0_28] : memref<8x2xf32, #tpu.memory_space<vmem>>, vector<8x2xf32>
    tpu.vector_store %arg10[%c0_27, %c0_28], %47 {strides = array<i32>} : memref<8x2xf32, #tpu.memory_space<vmem>>, vector<8x2xf32>,
    return
  }
  func.func @transform_0(%arg0: i32) -> (i32, i32) {
    %c0_i32 = arith.constant 0 : i32
    %c0_i32_0 = arith.constant 0 : i32
    return %arg0, %c0_i32 : i32, i32
  }
  func.func @transform_1(%arg0: i32) -> (i32, i32) {
    %c0_i32 = arith.constant 0 : i32
    %c0_i32_0 = arith.constant 0 : i32
    %c0_i32_1 = arith.constant 0 : i32
    return %c0_i32, %c0_i32_0 : i32, i32
  }
  func.func @transform_2(%arg0: i32) -> (i32, i32) {
    %c0_i32 = arith.constant 0 : i32
    %c0_i32_0 = arith.constant 0 : i32
    %c0_i32_1 = arith.constant 0 : i32
    return %c0_i32, %c0_i32_0 : i32, i32
  }
  func.func @transform_3(%arg0: i32) -> (i32, i32) {
    %c0_i32 = arith.constant 0 : i32
    %c0_i32_0 = arith.constant 0 : i32
    %c0_i32_1 = arith.constant 0 : i32
    return %c0_i32, %c0_i32_0 : i32, i32
  }
  func.func @transform_4(%arg0: i32) -> (i32, i32) {
    %c0_i32 = arith.constant 0 : i32
    %c0_i32_0 = arith.constant 0 : i32
    %c0_i32_1 = arith.constant 0 : i32
    return %c0_i32, %c0_i32_0 : i32, i32
  }
  func.func @transform_5(%arg0: i32) -> (i32, i32) {
    %c0_i32 = arith.constant 0 : i32
    %c0_i32_0 = arith.constant 0 : i32
    %c0_i32_1 = arith.constant 0 : i32
    return %c0_i32, %c0_i32_0 : i32, i32
  }
  func.func @transform_6(%arg0: i32) -> (i32, i32) {
    %c0_i32 = arith.constant 0 : i32
    %c0_i32_0 = arith.constant 0 : i32
    %c0_i32_1 = arith.constant 0 : i32
    return %c0_i32, %c0_i32_0 : i32, i32
  }
  func.func @transform_7(%arg0: i32) -> (i32, i32) {
    %c0_i32 = arith.constant 0 : i32
    %c0_i32_0 = arith.constant 0 : i32
    %c0_i32_1 = arith.constant 0 : i32
    return %c0_i32, %c0_i32_0 : i32, i32
  }
  func.func @transform_8(%arg0: i32) -> (i32, i32) {
    %c0_i32 = arith.constant 0 : i32
    %c0_i32_0 = arith.constant 0 : i32
    %c0_i32_1 = arith.constant 0 : i32
    return %c0_i32, %c0_i32_0 : i32, i32
  }
  func.func @transform_9(%arg0: i32) -> (i32, i32) {
    %c0_i32 = arith.constant 0 : i32
    %c0_i32_0 = arith.constant 0 : i32
    return %arg0, %c0_i32 : i32, i32
  }
}

</mosaic_0001>

<bundles_post_ra>
// kernel: tpu_custom_call.1
= control target key start
LH: loop header
LB: loop body
LE: loop exit
PB: predicated region body
PF: predicated region fallthrough
CT: control target
= control target key end

     0   :  { %s1016_s0 = inlined_call_operand.vmem [shape: f32[8,32], index: 0, kind: input, shape index: {}]   ;;  %s1017_s1 = inlined_call_operand.hbm [shape: f32[32,128], index: 1, kind: input, shape index: {}]   ;;  %s1018_s2 = inlined_call_operand.vmem [shape: f32[1,128], index: 2, kind: input, shape index: {}]   ;;  %s1019_s3 = inlined_call_operand.vmem [shape: f32[128,128], index: 3, kind: input, shape index: {}]   ;;  %s1020_s4 = inlined_call_operand.vmem [shape: f32[1,128], index: 4, kind: input, shape index: {}]   ;;  %s1021_s5 = inlined_call_operand.hbm [shape: f32[128,128], index: 5, kind: input, shape index: {}]   ;;  %s1022_s6 = inlined_call_operand.vmem [shape: f32[1,128], index: 6, kind: input, shape index: {}]   ;;  %s1023_s7 = inlined_call_operand.vmem [shape: f32[128,1], index: 7, kind: input, shape index: {}]   ;;  %s1024_s8 = inlined_call_operand.<no memory space> [shape: f32[1,1], index: 8, kind: input, shape index: {}]   ;;  %s1025_s9 = inlined_call_operand.vmem [shape: f32[8,2], index: 9, kind: output, shape index: {}]  }
   0x1   :  { %v14_v0 = vstv %s1024_s8 }
   0x2   :  { %15 = vst [vmem:[#allocation2] sm:$0x1] %v14_v0 }
   0x3   :  { %16 = vsyncpa [#allocation4], 0 }
   0x4   :  { %17 = vsyncpa [#allocation6], 0  ;;  %s786_s11 = smov [#allocation3]   ;;  %s738_s15 = scalar_lea.hbm %s1017_s1, 512 }
   0x5   :  { %s25_s12 = sshll.u32 %s786_s11, 4  ;;  %p739_p0 = scmp.ne.s32.totalorder %s1017_s1, %s738_s15  ;;  %s26_s12 = int_to_ptr.vmem [resolvable:$true] %s25_s12 }
   0x6   :  { %p742_p1 = scmp.lt.u32.totalorder %s738_s15, %s1017_s1 }
   0x8   :  { %p744_p2 = pnand %p742_p1, %p739_p0 }
   0xa   :  { %747 = shalt.err (!%p744_p2)
}
   0xb   :  { %s748_s8 = scalar_lea.vmem %s26_s12, 512  ;;  %p753_p4 = scmp.lt.s32.totalorder %s26_s12, %s26_s12 }
   0xc   :  { %p749_p3 = scmp.ne.s32.totalorder %s26_s12, %s748_s8  ;;  %p754_p5 = scmp.lt.s32.totalorder %s748_s8, %s748_s8 }
   0xe   :  { %p755_p6 = por %p754_p5, %p753_p4 }
  0x10   :  { %p756_p7 = pnand %p755_p6, %p749_p3 }
  0x12   :  { %759 = shalt.err (!%p756_p7)
}
  0x13   :  { %s787_s20 = smov 128   ;;  %s788_s21 = smov 8  }
  0x14   :  { %31 = dma.hbm_to_vmem [thread:$0]  %s1017_s1, 512, %s26_s12, [#allocation4], %s787_s20, %s787_s20, %s788_s21  }
  0x15   :  { %s789_s24 = smov [#allocation5]   ;;  %s760_s28 = scalar_lea.hbm %s1021_s5, 2048 }
  0x16   :  { %s43_s25 = sshll.u32 %s789_s24, 4  ;;  %p761_p8 = scmp.ne.s32.totalorder %s1021_s5, %s760_s28  ;;  %s44_s25 = int_to_ptr.vmem [resolvable:$true] %s43_s25 }
  0x17   :  { %p764_p9 = scmp.lt.u32.totalorder %s760_s28, %s1021_s5 }
  0x19   :  { %p766_p10 = pnand %p764_p9, %p761_p8 }
  0x1b   :  { %769 = shalt.err (!%p766_p10)
}
  0x1c   :  { %s770_s13 = scalar_lea.vmem %s44_s25, 2048  ;;  %p775_p12 = scmp.lt.s32.totalorder %s44_s25, %s44_s25 }
  0x1d   :  { %p771_p11 = scmp.ne.s32.totalorder %s44_s25, %s770_s13  ;;  %p776_p13 = scmp.lt.s32.totalorder %s770_s13, %s770_s13 }
  0x1f   :  { %p777_p0 = por %p776_p13, %p775_p12 }
  0x21   :  { %p778_p1 = pnand %p777_p0, %p771_p11 }
  0x23   :  { %781 = shalt.err (!%p778_p1)
}
  0x24   :  { %49 = dma.hbm_to_vmem [thread:$0]  %s1021_s5, 2048, %s44_s25, [#allocation6], %s787_s20, %s787_s20, %s788_s21  }
  0x25   :  { %782 = dma.done.wait [#allocation4], 512  }
  0x26   :  { %783 = vsyncadd [#allocation4], 4294966784 }
  0x27   :  { %784 = dma.done.wait [#allocation6], 2048  }
  0x28   :  { %785 = vsyncadd [#allocation6], 4294965248  ;;  %v790_v1 = vmov 0.0|0.0   ;;  %vm791_vm0 = vmmov 0   ;;  %v792_v2 = vmov 0.0   ;;  %v63_v3 = vld [vmem:[#allocation3] sm:$0xff] }
  0x29   :  { %647 = vmatprep.subr.bf16.mxu0 %v790_v1  ;;  %539 = vmatprep.mubr.msk.f32.mxu0 %vm791_vm0, %v792_v2  ;;  %v64_v4 = vld [vmem:[#allocation3 + $0x8] sm:$0xff]  ;;  %v65_v5 = vld [vmem:[#allocation3 + $0x10] sm:$0xff]  ;;  %v66_v7 = vld [vmem:[#allocation3 + $0x18] sm:$0xff]  ;;  %vm74_vm1 = vcmask 261120   ;;  %vm462_vm4 = vcmask 15360  }
  0x2a   :  { %653 = vmatprep.subr.bf16.mxu1 %v790_v1  ;;  %574 = vmatprep.mubr.msk.f32.mxu1 %vm791_vm0, %v792_v2  ;;  %v648_v6 = vpack.c.bf16 %v64_v4, %v63_v3  ;;  %v149_v8 = vld [vmem:[%s1019_s3] sm:$0xff]  ;;  %v150_v9 = vld [vmem:[%s1019_s3 + $0x8] sm:$0xff]  ;;  %v151_v10 = vld [vmem:[%s1019_s3 + $0x10] sm:$0xff]  ;;  %v651_v12 = vpack.c.bf16 %v66_v7, %v65_v5 }
  0x2b   :  { %v152_v11 = vld [vmem:[%s1019_s3 + $0x18] sm:$0xff]  ;;  %v654_v13 = vpack.c.bf16 %v150_v9, %v149_v8  ;;  %v153_v15 = vld [vmem:[%s1019_s3 + $0x20] sm:$0xff]  ;;  %v154_v16 = vld [vmem:[%s1019_s3 + $0x28] sm:$0xff] }
  0x2c   :  { %649 = vmatpush3.bf16.msra.mxu0 %v648_v6  ;;  %v657_v14 = vpack.c.bf16 %v152_v11, %v151_v10  ;;  %v62_v17 = vld [vmem:[%s1016_s0] sm:$0xff]  ;;  %v660_v18 = vpack.c.bf16 %v154_v16, %v153_v15  ;;  %v155_v19 = vld [vmem:[%s1019_s3 + $0x30] sm:$0xff]  ;;  %v156_v20 = vld [vmem:[%s1019_s3 + $0x38] sm:$0xff] }
  0x2d   :  { %650 = vmatprep.subr.bf16.mxu0 %v790_v1  ;;  %655 = vmatpush3.bf16.msra.mxu1 %v654_v13  ;;  %v663_v21 = vpack.c.bf16 %v156_v20, %v155_v19  ;;  %v157_v22 = vld [vmem:[%s1019_s3 + $0x40] sm:$0xff]  ;;  %v158_v23 = vld [vmem:[%s1019_s3 + $0x48] sm:$0xff]  ;;  %v159_v25 = vld [vmem:[%s1019_s3 + $0x50] sm:$0xff] }
  0x2e   :  { %656 = vmatprep.subr.bf16.mxu1 %v790_v1  ;;  %v666_v24 = vpack.c.bf16 %v158_v23, %v157_v22  ;;  %v160_v26 = vld [vmem:[%s1019_s3 + $0x58] sm:$0xff]  ;;  %v161_v28 = vld [vmem:[%s1019_s3 + $0x60] sm:$0xff]  ;;  %v162_v29 = vld [vmem:[%s1019_s3 + $0x68] sm:$0xff] }
  0x2f   :  { %v669_v27 = vpack.c.bf16 %v160_v26, %v159_v25  ;;  %v672_v30 = vpack.c.bf16 %v162_v29, %v161_v28  ;;  %v163_v31 = vld [vmem:[%s1019_s3 + $0x70] sm:$0xff]  ;;  %v164_v32 = vld [vmem:[%s1019_s3 + $0x78] sm:$0xff]  ;;  %v243_v34 = vld [vmem:[#allocation5] sm:$0xff] }
  0x30   :  { %652 = vmatpush3.bf16.msra.mxu0 %v651_v12  ;;  %v675_v33 = vpack.c.bf16 %v164_v32, %v163_v31  ;;  %v244_v35 = vld [vmem:[#allocation5 + $0x8] sm:$0xff]  ;;  %v245_v36 = vld [vmem:[#allocation5 + $0x10] sm:$0xff]  ;;  %v246_v38 = vld [vmem:[#allocation5 + $0x18] sm:$0xff] }
  0x31   :  { %677 = vmatprep.subr.bf16.mxu0 %v790_v1  ;;  %658 = vmatpush3.bf16.msra.mxu1 %v657_v14  ;;  %v678_v37 = vpack.c.bf16 %v244_v35, %v243_v34  ;;  %v681_v39 = vpack.c.bf16 %v246_v38, %v245_v36  ;;  %v247_v40 = vld [vmem:[#allocation5 + $0x20] sm:$0xff]  ;;  %v248_v41 = vld [vmem:[#allocation5 + $0x28] sm:$0xff]  ;;  %v249_v43 = vld [vmem:[#allocation5 + $0x30] sm:$0xff] }
  0x32   :  { %659 = vmatprep.subr.bf16.mxu1 %v790_v1  ;;  %v684_v42 = vpack.c.bf16 %v248_v41, %v247_v40  ;;  %v250_v44 = vld [vmem:[#allocation5 + $0x38] sm:$0xff]  ;;  %v251_v46 = vld [vmem:[#allocation5 + $0x40] sm:$0xff]  ;;  %v252_v47 = vld [vmem:[#allocation5 + $0x48] sm:$0xff] }
  0x33   :  { %540 = vmatmul.mubr.msk.f32.vlgmr.msra.gmra.mrb[0].mxu0 %vm74_vm1, %v62_v17  ;;  %v687_v45 = vpack.c.bf16 %v250_v44, %v249_v43  ;;  %v690_v48 = vpack.c.bf16 %v252_v47, %v251_v46  ;;  %v253_v49 = vld [vmem:[#allocation5 + $0x50] sm:$0xff]  ;;  %v254_v50 = vld [vmem:[#allocation5 + $0x58] sm:$0xff]  ;;  %v255_v52 = vld [vmem:[#allocation5 + $0x60] sm:$0xff] }
  0x34   :  { %609 = vmatprep.mubr.msk.f32.mxu0 %vm791_vm0, %v792_v2  ;;  %679 = vmatpush3.bf16.msra.mxu0 %v678_v37  ;;  %v693_v51 = vpack.c.bf16 %v254_v50, %v253_v49  ;;  %v256_v53 = vld [vmem:[#allocation5 + $0x68] sm:$0xff]  ;;  %v470_v55 = vld [vmem:[%s1018_s2] ss:$0 sm:$0xff]  ;;  %v257_v60 = vld [vmem:[#allocation5 + $0x70] sm:$0xff] }
  0x35   :  { %661 = vmatpush3.bf16.msra.mxu1 %v660_v18  ;;  %680 = vmatprep.subr.bf16.mxu0 %v790_v1  ;;  %v696_v54 = vpack.c.bf16 %v256_v53, %v255_v52  ;;  %v258_v61 = vld [vmem:[#allocation5 + $0x78] sm:$0xff]  ;;  %v338_v0 = vld [vmem:[%s1023_s7 + $0x8] sm:$0xff]  ;;  %v339_v3 = vld [vmem:[%s1023_s7 + $0x10] sm:$0xff] }
  0x36   :  { %662 = vmatprep.subr.bf16.mxu1 %v790_v1  ;;  %v699_v62 = vpack.c.bf16 %v258_v61, %v257_v60  ;;  %v337_v63 = vld [vmem:[%s1023_s7] sm:$0xff]  ;;  %v342_v7 = vld [vmem:[%s1023_s7 + $0x28] sm:$0xff]  ;;  %v343_v9 = vld [vmem:[%s1023_s7 + $0x30] sm:$0xff] }
  0x37   :  { %v702_v4 = vpack.c.bf16 %v338_v0, %v337_v63  ;;  %v341_v6 = vld [vmem:[%s1023_s7 + $0x20] sm:$0xff]  ;;  %v344_v10 = vld [vmem:[%s1023_s7 + $0x38] sm:$0xff]  ;;  %v346_v13 = vld [vmem:[%s1023_s7 + $0x48] sm:$0xff] }
  0x38   :  { %682 = vmatpush3.bf16.msra.mxu0 %v681_v39  ;;  %v708_v8 = vpack.c.bf16 %v342_v7, %v341_v6  ;;  %v711_v11 = vpack.c.bf16 %v344_v10, %v343_v9  ;;  %v345_v12 = vld [vmem:[%s1023_s7 + $0x40] sm:$0xff]  ;;  %v347_v15 = vld [vmem:[%s1023_s7 + $0x50] sm:$0xff]  ;;  %v348_v16 = vld [vmem:[%s1023_s7 + $0x58] sm:$0xff] }
  0x39   :  { %664 = vmatpush3.bf16.msra.mxu1 %v663_v21  ;;  %683 = vmatprep.subr.bf16.mxu0 %v790_v1  ;;  %v714_v14 = vpack.c.bf16 %v346_v13, %v345_v12  ;;  %v717_v17 = vpack.c.bf16 %v348_v16, %v347_v15  ;;  %v349_v18 = vld [vmem:[%s1023_s7 + $0x60] sm:$0xff]  ;;  %v350_v19 = vld [vmem:[%s1023_s7 + $0x68] sm:$0xff]  ;;  %v351_v26 = vld [vmem:[%s1023_s7 + $0x70] sm:$0xff] }
  0x3a   :  { %665 = vmatprep.subr.bf16.mxu1 %v790_v1  ;;  %v720_v20 = vpack.c.bf16 %v350_v19, %v349_v18  ;;  %v472_v21 = vld [vmem:[%s1020_s4] ss:$0 sm:$0xff] }
  0x3b   :  { %v474_v34 = vld [vmem:[#allocation2] ss:$0 sm:$0xff] }
  0x3c   :  { %685 = vmatpush3.bf16.msra.mxu0 %v684_v42 }
  0x3d   :  { %667 = vmatpush3.bf16.msra.mxu1 %v666_v24  ;;  %686 = vmatprep.subr.bf16.mxu0 %v790_v1 }
  0x3e   :  { %668 = vmatprep.subr.bf16.mxu1 %v790_v1 }
  0x40   :  { %688 = vmatpush3.bf16.msra.mxu0 %v687_v45 }
  0x41   :  { %670 = vmatpush3.bf16.msra.mxu1 %v669_v27  ;;  %689 = vmatprep.subr.bf16.mxu0 %v790_v1  ;;  %v352_v27 = vld [vmem:[%s1023_s7 + $0x78] sm:$0xff] }
  0x42   :  { %671 = vmatprep.subr.bf16.mxu1 %v790_v1  ;;  %v723_v28 = vpack.c.bf16 %v352_v27, %v351_v26 }
  0x44   :  { %691 = vmatpush3.bf16.msra.mxu0 %v690_v48 }
  0x45   :  { %673 = vmatpush3.bf16.msra.mxu1 %v672_v30  ;;  %692 = vmatprep.subr.bf16.mxu0 %v790_v1 }
  0x46   :  { %674 = vmatprep.subr.bf16.mxu1 %v790_v1 }
  0x48   :  { %694 = vmatpush3.bf16.msra.mxu0 %v693_v51 }
  0x49   :  { %676 = vmatpush3.bf16.msra.mxu1 %v675_v33  ;;  %695 = vmatprep.subr.bf16.mxu0 %v790_v1  ;;  %v793_v33 = vmov 0  }
  0x4a   :  { %701 = vmatprep.subr.bf16.mxu1 %v790_v1  ;;  %733 = vset.pattern.permute.xlu0 %v793_v33 }
  0x4c   :  { %697 = vmatpush3.bf16.msra.mxu0 %v696_v54 }
  0x4d   :  { %698 = vmatprep.subr.bf16.mxu0 %v790_v1 }
  0x50   :  { %700 = vmatpush3.bf16.msra.mxu0 %v699_v62 }
 0x106   :  { %v144_v56 = vpop.f32.mrb[0].mxu0 }
 0x107   :  { %v145_v57 = vadd.f32 %v470_v55, %v144_v56  ;;  %v541_v58 = vpop.f32.mrb[1].mxu0  ;;  %v446_v55 = vlaneseq }
 0x109   :  { %v148_v59 = vmax.f32 %v145_v57, 0.0  ;;  %v447_v56 = vand.u32 127, %v446_v55 }
 0x10b   :  { %575 = vmatmul.mubr.f32.vlgmr.msra.gmra.mrb[0].mxu1 %v148_v59  ;;  %vm448_vm3 = vcmp.eq.s32.totalorder %v447_v56, 0 }
 0x10c   :  { %644 = vmatprep.mubr.msk.f32.mxu1 %vm791_vm0, %v792_v2  ;;  %v340_v2 = vld [vmem:[%s1023_s7 + $0x18] sm:$0xff]  ;;  %703 = vmatpush3.bf16.msra.mxu1 %v702_v4 }
 0x10d   :  { %v705_v5 = vpack.c.bf16 %v340_v2, %v339_v3  ;;  %704 = vmatprep.subr.bf16.mxu1 %v790_v1 }
 0x110   :  { %706 = vmatpush3.bf16.msra.mxu1 %v705_v5 }
 0x111   :  { %707 = vmatprep.subr.bf16.mxu1 %v790_v1 }
 0x114   :  { %709 = vmatpush3.bf16.msra.mxu1 %v708_v8 }
 0x115   :  { %710 = vmatprep.subr.bf16.mxu1 %v790_v1 }
 0x118   :  { %712 = vmatpush3.bf16.msra.mxu1 %v711_v11 }
 0x119   :  { %713 = vmatprep.subr.bf16.mxu1 %v790_v1 }
 0x11c   :  { %715 = vmatpush3.bf16.msra.mxu1 %v714_v14 }
 0x11d   :  { %716 = vmatprep.subr.bf16.mxu1 %v790_v1 }
 0x120   :  { %718 = vmatpush3.bf16.msra.mxu1 %v717_v17 }
 0x121   :  { %719 = vmatprep.subr.bf16.mxu1 %v790_v1 }
 0x124   :  { %721 = vmatpush3.bf16.msra.mxu1 %v720_v20 }
 0x125   :  { %722 = vmatprep.subr.bf16.mxu1 %v790_v1  ;;  %v473_v1 = vld [vmem:[%s1022_s6] ss:$0 sm:$0xff] }
 0x128   :  { %724 = vmatpush3.bf16.msra.mxu1 %v723_v28 }
 0x1de   :  { %v238_v22 = vpop.f32.mrb[0].mxu1 }
 0x1df   :  { %v239_v23 = vadd.f32 %v472_v21, %v238_v22  ;;  %v576_v24 = vpop.f32.mrb[1].mxu1 }
 0x1e1   :  { %v242_v25 = vmax.f32 %v239_v23, 0.0 }
 0x1e3   :  { %610 = vmatmul.mubr.f32.vlgmr.msra.gmra.mrb[2].mxu0 %v242_v25 }
 0x2b6   :  { %v332_v29 = vpop.f32.mrb[2].mxu0 }
 0x2b7   :  { %v333_v30 = vadd.f32 %v473_v1, %v332_v29  ;;  %v611_v31 = vpop.f32.mrb[3].mxu0 }
 0x2b9   :  { %v336_v32 = vmax.f32 %v333_v30, 0.0 }
 0x2bb   :  { %645 = vmatmul.mubr.f32.vlgmr.msra.gmra.mrb[2].mxu1 %v336_v32 }
 0x38e   :  { %v426_v35 = vpop.f32.mrb[2].mxu1 }
 0x38f   :  { %v427_v36 = vadd.f32 %v474_v34, %v426_v35  ;;  %v646_v37 = vpop.f32.mrb[3].mxu1 }
 0x391   :  { %v431_v38 = vand.u32 2147483647, %v427_v36  ;;  %v430_v49 = vmax.f32 %v427_v36, 0.0 }
 0x393   :  { %v432_v39 = vsub.f32 0.0, %v431_v38 }
 0x395   :  { %v433_v40 = vmul.f32 1.442695, %v432_v39 }
 0x397   :  { %734 = vpow2.f32 %v433_v40 }
 0x3a1   :  { %v735_v41 = vpop.eup %734 }
 0x3a2   :  { %v435_v42 = vadd.f32 1.0, %v735_v41  ;;  %v438_v43 = vmul.f32 -0.5, %v735_v41  ;;  %v441_v45 = vand.u32 2147483647, %v735_v41 }
 0x3a4   :  { %736 = vlog2.f32 %v435_v42  ;;  %v439_v44 = vadd.f32 1.0, %v438_v43  ;;  %vm442_vm2 = vcmp.lt.f32.partialorder %v441_v45, 0.0004427343 }
 0x3a6   :  { %v440_v48 = vmul.f32 %v735_v41, %v439_v44 }
 0x3ae   :  { %v737_v46 = vpop.eup %736 }
 0x3af   :  { %v437_v47 = vmul.f32 0.6931472, %v737_v46 }
 0x3b1   :  { %v443_v50 = vsel %vm442_vm2, %v440_v48, %v437_v47 }
 0x3b2   :  { %v444_v51 = vadd.f32 %v443_v50, %v430_v49 }
 0x3b4   :  { %v449_v52 = vsub.f32 0.0, %v444_v51  ;;  %v445_v53 = vsub.f32 %v444_v51, %v427_v36 }
 0x3b6   :  { %453 = vperm.xlu0 %733, %v449_v52   ;;  %v450_v54 = vsub.f32 0.0, %v445_v53 }
 0x3ba   :  { %458 = vperm.xlu0 %733, %v450_v54  }
 0x435   :  { %v454_v57 = vpop.permute.xlu0 %453 }
 0x439   :  { %v459_v58 = vpop.permute.xlu0 %458 }
 0x43a   :  { %v461_v59 = vsel %vm448_vm3, %v454_v57, %v459_v58 }
 0x43b   :  { %463 = vst.msk [vmem:[%s1025_s9] sm:$0xff] %vm462_vm4, %v461_v59 }
 0x43c   :  { %468 = vsyncpa [#allocation4], 1 }
 0x43d   :  { %469 = vsyncpa [#allocation6], 1 }

</bundles_post_ra>
